<compile_context>
chip_gen: v6e
topology: v6e:2x2x1
jax: 0.10.0
libtpu: 0.0.40
codegen_flags: <defaults>
</compile_context>

<pallas_src>
import jax
import jax.numpy as jnp
from jax.experimental import pallas as pl
from jax.experimental.pallas import tpu as pltpu


HIDDEN = 64   # fixed by the module: Linear(2*input_size, 64)
LANE = 128    # TPU vreg lane width


def _round_up(x, m):
    return (x + m - 1) // m * m


def _goal_obs_q_kernel(state_ref, demo_ref, w1a_ref, w1b_ref,
                       b1_ref, w2_ref, b2_ref, out_ref):
    # combination_layer: concat(state, demo_last) @ W1 + b1
    #   == state @ W1[:D] + demo_last @ W1[D:] + b1   (exact split of the concat)
    h = jnp.dot(state_ref[...], w1a_ref[...],
                preferred_element_type=jnp.float32)
    h = h + jnp.dot(demo_ref[...], w1b_ref[...],
                    preferred_element_type=jnp.float32)
    h = jnp.maximum(h + b1_ref[...], 0.0)                       # (bm, 128) f32

    # output_layer (W2 zero-padded on the hidden rows -> exact)
    q = jnp.dot(h.astype(w2_ref.dtype), w2_ref[...],
                preferred_element_type=jnp.float32)
    out_ref[...] = (q + b2_ref[...]).astype(out_ref.dtype)      # (bm, A)


def prepare_params(params, input_size, *, compute_dtype=jnp.bfloat16):
    """One-time (param-load time) padding / casting of the module parameters.

    Keeping this out of the per-call path removes several small XLA ops and
    HBM round trips from every forward (matters for RL-style small batches).
    """
    w1, b1, w2, b2 = params["w1"], params["b1"], params["w2"], params["b2"]
    D = input_size
    H = w1.shape[1]                              # 64
    A = w2.shape[1]
    H_PAD = _round_up(max(H, LANE), LANE)        # 128 -> lane-dense hidden
    return {
        "w1a": jnp.pad(w1[:D, :], ((0, 0), (0, H_PAD - H))).astype(compute_dtype),
        "w1b": jnp.pad(w1[D:, :], ((0, 0), (0, H_PAD - H))).astype(compute_dtype),
        "b1":  jnp.pad(b1, (0, H_PAD - H)).reshape(1, H_PAD).astype(jnp.float32),
        "w2":  jnp.pad(w2, ((0, H_PAD - H), (0, 0))).astype(compute_dtype),
        "b2":  b2.reshape(1, A).astype(jnp.float32),
    }


def goal_obs_q_forward(state, demonstration, prepared, *, block_m=1024):
    """state: (T, B, D) f32; demonstration: (T, B, L, D) f32.
    Returns q of shape (T, B, action_dim), matching the PyTorch module.
    (The module's constant zero RnnState is never returned by forward; omitted.)
    """
    T, B, D = state.shape
    M = T * B
    H_PAD = prepared["w1a"].shape[1]
    A = prepared["w2"].shape[1]
    compute_dtype = prepared["w1a"].dtype

    # Only the last demonstration step is ever used by the module: slice it in
    # the wrapper (M*D read+write) instead of streaming all M*L*D bytes through
    # the kernel.  Cast MXU operands to bf16 (f32 accumulation in-kernel).
    demo_last = demonstration[:, :, -1, :].reshape(M, D).astype(compute_dtype)
    state_2d = state.reshape(M, D).astype(compute_dtype)

    # Row-tile size: multiple of 8 (sublane), capped by the problem size.  When
    # everything would fit in a single tile but there are >= 16 rows, split into
    # two tiles so the "parallel" grid axis can use both v7x TensorCores.
    m8 = _round_up(M, 8)
    block_m = max(8, min(block_m, m8))
    if m8 >= 16 and m8 <= block_m:
        block_m = _round_up(m8 // 2, 8)
    M_pad = _round_up(M, block_m)
    n_blocks = M_pad // block_m

    # Row padding touches only the two small (M, D) arrays, never the full demo.
    if M_pad != M:
        state_2d = jnp.pad(state_2d, ((0, M_pad - M), (0, 0)))
        demo_last = jnp.pad(demo_last, ((0, M_pad - M), (0, 0)))

    q_pad = pl.pallas_call(
        _goal_obs_q_kernel,
        out_shape=jax.ShapeDtypeStruct((M_pad, A), jnp.float32),
        grid_spec=pltpu.PrefetchScalarGridSpec(
            num_scalar_prefetch=0,
            grid=(n_blocks,),
            in_specs=[
                pl.BlockSpec((block_m, D), lambda i: (i, 0)),     # state rows
                pl.BlockSpec((block_m, D), lambda i: (i, 0)),     # demo last step
                pl.BlockSpec((D, H_PAD), lambda i: (0, 0)),       # W1[:D]   (resident)
                pl.BlockSpec((D, H_PAD), lambda i: (0, 0)),       # W1[D:]   (resident)
                pl.BlockSpec((1, H_PAD), lambda i: (0, 0)),       # b1       (resident)
                pl.BlockSpec((H_PAD, A), lambda i: (0, 0)),       # W2       (resident)
                pl.BlockSpec((1, A), lambda i: (0, 0)),           # b2       (resident)
            ],
            out_specs=pl.BlockSpec((block_m, A), lambda i: (i, 0)),
        ),
        compiler_params=pltpu.CompilerParams(
            dimension_semantics=("parallel",)),
    )(state_2d, demo_last, prepared["w1a"], prepared["w1b"],
      prepared["b1"], prepared["w2"], prepared["b2"])

    return q_pad[:M].reshape(T, B, A)


def init_params(input_size, action_dim, key):
    """Deterministic synthetic parameters with the shapes the module implies."""
    k1, k2, k3, k4 = jax.random.split(key, 4)
    scale1 = 1.0 / jnp.sqrt(2.0 * input_size)
    scale2 = 1.0 / jnp.sqrt(float(HIDDEN))
    return {
        "w1": jax.random.normal(k1, (2 * input_size, HIDDEN), jnp.float32) * scale1,
        "b1": jax.random.normal(k2, (HIDDEN,), jnp.float32) * scale1,
        "w2": jax.random.normal(k3, (HIDDEN, action_dim), jnp.float32) * scale2,
        "b2": jax.random.normal(k4, (action_dim,), jnp.float32) * scale2,
    }


def _reference(state, demonstration, params):
    # Pure-JAX f32 reference of the PyTorch forward.
    x = jnp.concatenate([state, demonstration[:, :, -1, :]], axis=-1)
    h = jax.nn.relu(x @ params["w1"] + params["b1"])
    return h @ params["w2"] + params["b2"]          # (T, B, action_dim)


if __name__ == "__main__":
    # Small shapes consistent with the module:
    T, B = 2, 2
    input_size = 16          # env_spaces.observation.shape.state[0]
    demo_len = 8             # env_spaces.observation.shape.demonstration[0]
    action_dim = 4           # env_spaces.action.n

    key = jax.random.PRNGKey(0)
    k_state, k_demo, k_params = jax.random.split(key, 3)
    state = jax.random.normal(k_state, (T, B, input_size), jnp.float32)
    demonstration = jax.random.normal(
        k_demo, (T, B, demo_len, input_size), jnp.float32)

    params = init_params(input_size, action_dim, k_params)
    prepared = prepare_params(params, input_size)     # once, outside the hot path

    fwd = jax.jit(goal_obs_q_forward)
    q = jax.block_until_ready(fwd(state, demonstration, prepared))

    q_ref = _reference(state, demonstration, params)
    assert q.shape == (T, B, action_dim)
    # bf16 MXU operands with f32 accumulation -> compare loosely to f32 reference.
    assert jnp.allclose(q, q_ref, atol=5e-2, rtol=5e-2), "mismatch vs reference"

    print("KERNEL_OK")
</pallas_src>

<mosaic_0001>
module attributes {stable_mosaic.version = 11 : i64} {
  func.func @_goal_obs_q_kernel(%arg0: i32, %arg1: memref<8x16xbf16, #tpu.memory_space<vmem>>, %arg2: memref<8x16xbf16, #tpu.memory_space<vmem>>, %arg3: memref<16x128xbf16, #tpu.memory_space<vmem>>, %arg4: memref<16x128xbf16, #tpu.memory_space<vmem>>, %arg5: memref<1x128xf32, #tpu.memory_space<vmem>>, %arg6: memref<128x4xbf16, #tpu.memory_space<vmem>>, %arg7: memref<1x4xf32, #tpu.memory_space<vmem>>, %arg8: memref<8x4xf32, #tpu.memory_space<vmem>>) attributes {dimension_semantics = [#tpu.dimension_semantics<parallel>], iteration_bounds = array<i64: 1>, scalar_prefetch = 0 : i64, scratch_operands = 0 : i64, tpu.core_type = #tpu.core_type<tc>, window_params = [{transform_indices = @transform_0, window_bounds = array<i64: 8, 16>}, {transform_indices = @transform_1, window_bounds = array<i64: 8, 16>}, {pipeline_mode = #tpu.pipeline_mode<synchronous>, transform_indices = @transform_2, window_bounds = array<i64: 16, 128>}, {pipeline_mode = #tpu.pipeline_mode<synchronous>, transform_indices = @transform_3, window_bounds = array<i64: 16, 128>}, {pipeline_mode = #tpu.pipeline_mode<synchronous>, transform_indices = @transform_4, window_bounds = array<i64: 1, 128>}, {pipeline_mode = #tpu.pipeline_mode<synchronous>, transform_indices = @transform_5, window_bounds = array<i64: 128, 4>}, {pipeline_mode = #tpu.pipeline_mode<synchronous>, transform_indices = @transform_6, window_bounds = array<i64: 1, 4>}, {transform_indices = @transform_7, window_bounds = array<i64: 8, 4>}]} {
    %c0 = arith.constant 0 : index
    %c0_0 = arith.constant 0 : index
    %0 = vector.load %arg1[%c0, %c0_0] : memref<8x16xbf16, #tpu.memory_space<vmem>>, vector<8x16xbf16>
    %c0_1 = arith.constant 0 : index
    %c0_2 = arith.constant 0 : index
    %1 = vector.load %arg3[%c0_1, %c0_2] : memref<16x128xbf16, #tpu.memory_space<vmem>>, vector<16x128xbf16>
    %cst = arith.constant dense<0.000000e+00> : vector<8x128xf32>
    %2 = tpu.matmul %0, %1, %cst {dimension_numbers = #tpu.dot_dimension_numbers<[1], [0], [0], [1], [0, 0, 1, 1], [], []>} : vector<8x16xbf16>, vector<16x128xbf16>, vector<8x128xf32> -> vector<8x128xf32>
    %c0_3 = arith.constant 0 : index
    %c0_4 = arith.constant 0 : index
    %3 = vector.load %arg2[%c0_3, %c0_4] : memref<8x16xbf16, #tpu.memory_space<vmem>>, vector<8x16xbf16>
    %c0_5 = arith.constant 0 : index
    %c0_6 = arith.constant 0 : index
    %4 = vector.load %arg4[%c0_5, %c0_6] : memref<16x128xbf16, #tpu.memory_space<vmem>>, vector<16x128xbf16>
    %cst_7 = arith.constant dense<0.000000e+00> : vector<8x128xf32>
    %5 = tpu.matmul %3, %4, %cst_7 {dimension_numbers = #tpu.dot_dimension_numbers<[1], [0], [0], [1], [0, 0, 1, 1], [], []>} : vector<8x16xbf16>, vector<16x128xbf16>, vector<8x128xf32> -> vector<8x128xf32>
    %6 = arith.addf %2, %5 : vector<8x128xf32>
    %c0_8 = arith.constant 0 : index
    %c0_9 = arith.constant 0 : index
    %7 = vector.load %arg5[%c0_8, %c0_9] : memref<1x128xf32, #tpu.memory_space<vmem>>, vector<1x128xf32>
    %8 = vector.broadcast %7 : vector<1x128xf32> to vector<8x128xf32>
    %9 = arith.addf %6, %8 : vector<8x128xf32>
    %cst_10 = arith.constant 0.000000e+00 : f32
    %10 = vector.broadcast %cst_10 : f32 to vector<8x128xf32>
    %11 = arith.maximumf %9, %10 : vector<8x128xf32>
    %12 = arith.truncf %11 : vector<8x128xf32> to vector<8x128xbf16>
    %c0_11 = arith.constant 0 : index
    %c0_12 = arith.constant 0 : index
    %13 = vector.load %arg6[%c0_11, %c0_12] : memref<128x4xbf16, #tpu.memory_space<vmem>>, vector<128x4xbf16>
    %cst_13 = arith.constant dense<0.000000e+00> : vector<8x4xf32>
    %14 = tpu.matmul %12, %13, %cst_13 {dimension_numbers = #tpu.dot_dimension_numbers<[1], [0], [0], [1], [0, 0, 1, 1], [], []>} : vector<8x128xbf16>, vector<128x4xbf16>, vector<8x4xf32> -> vector<8x4xf32>
    %c0_14 = arith.constant 0 : index
    %c0_15 = arith.constant 0 : index
    %15 = vector.load %arg7[%c0_14, %c0_15] : memref<1x4xf32, #tpu.memory_space<vmem>>, vector<1x4xf32>
    %16 = vector.broadcast %15 : vector<1x4xf32> to vector<8x4xf32>
    %17 = arith.addf %14, %16 : vector<8x4xf32>
    %c0_16 = arith.constant 0 : index
    %c0_17 = arith.constant 0 : index
    %18 = vector.load %arg8[%c0_16, %c0_17] : memref<8x4xf32, #tpu.memory_space<vmem>>, vector<8x4xf32>
    tpu.vector_store %arg8[%c0_16, %c0_17], %17 {strides = array<i32>} : memref<8x4xf32, #tpu.memory_space<vmem>>, vector<8x4xf32>,
    return
  }
  func.func @transform_0(%arg0: i32) -> (i32, i32) {
    %c0_i32 = arith.constant 0 : i32
    %c0_i32_0 = arith.constant 0 : i32
    return %arg0, %c0_i32 : i32, i32
  }
  func.func @transform_1(%arg0: i32) -> (i32, i32) {
    %c0_i32 = arith.constant 0 : i32
    %c0_i32_0 = arith.constant 0 : i32
    return %arg0, %c0_i32 : i32, i32
  }
  func.func @transform_2(%arg0: i32) -> (i32, i32) {
    %c0_i32 = arith.constant 0 : i32
    %c0_i32_0 = arith.constant 0 : i32
    %c0_i32_1 = arith.constant 0 : i32
    return %c0_i32, %c0_i32_0 : i32, i32
  }
  func.func @transform_3(%arg0: i32) -> (i32, i32) {
    %c0_i32 = arith.constant 0 : i32
    %c0_i32_0 = arith.constant 0 : i32
    %c0_i32_1 = arith.constant 0 : i32
    return %c0_i32, %c0_i32_0 : i32, i32
  }
  func.func @transform_4(%arg0: i32) -> (i32, i32) {
    %c0_i32 = arith.constant 0 : i32
    %c0_i32_0 = arith.constant 0 : i32
    %c0_i32_1 = arith.constant 0 : i32
    return %c0_i32, %c0_i32_0 : i32, i32
  }
  func.func @transform_5(%arg0: i32) -> (i32, i32) {
    %c0_i32 = arith.constant 0 : i32
    %c0_i32_0 = arith.constant 0 : i32
    %c0_i32_1 = arith.constant 0 : i32
    return %c0_i32, %c0_i32_0 : i32, i32
  }
  func.func @transform_6(%arg0: i32) -> (i32, i32) {
    %c0_i32 = arith.constant 0 : i32
    %c0_i32_0 = arith.constant 0 : i32
    %c0_i32_1 = arith.constant 0 : i32
    return %c0_i32, %c0_i32_0 : i32, i32
  }
  func.func @transform_7(%arg0: i32) -> (i32, i32) {
    %c0_i32 = arith.constant 0 : i32
    %c0_i32_0 = arith.constant 0 : i32
    return %arg0, %c0_i32 : i32, i32
  }
}

</mosaic_0001>

<bundles_post_ra>
// kernel: goal_obs_q_forward.1
= control target key start
LH: loop header
LB: loop body
LE: loop exit
PB: predicated region body
PF: predicated region fallthrough
CT: control target
= control target key end

     0   :  { %v330_v0 = vmov 0.0   ;;  %vm331_vm0 = vmmov 0   ;;  %vm39_vm1 = vcmask 130048   ;;  %vm253_vm2 = vcmask 31744   ;;  %s417_s3 = inlined_call_operand.vmem [shape: bf16[16,128], index: 3, kind: input, shape index: {}]   ;;  %s418_s1 = inlined_call_operand.vmem [shape: bf16[8,16], index: 1, kind: input, shape index: {}]   ;;  %s419_s2 = inlined_call_operand.vmem [shape: bf16[16,128], index: 2, kind: input, shape index: {}]   ;;  %s420_s5 = inlined_call_operand.vmem [shape: bf16[128,4], index: 5, kind: input, shape index: {}]   ;;  %s421_s0 = inlined_call_operand.vmem [shape: bf16[8,16], index: 0, kind: input, shape index: {}]   ;;  %s422_s4 = inlined_call_operand.vmem [shape: f32[1,128], index: 4, kind: input, shape index: {}]   ;;  %s423_s6 = inlined_call_operand.vmem [shape: f32[1,4], index: 6, kind: input, shape index: {}]   ;;  %s424_s7 = inlined_call_operand.vmem [shape: f32[8,4], index: 7, kind: output, shape index: {}]  }
   0x1   :  { %286 = vmatprep.subr.bf16.mxu1 %v330_v0  ;;  %v320_v1 = vld [vmem:[%s417_s3] sm:$0xff]   ;;  %288 = vmatprep.mubr.msk.bf16.mxu1 %vm331_vm0, %v330_v0  ;;  %v322_v4 = vld [vmem:[%s420_s5 + $0x38] sm:$0xff]   ;;  %v323_v5 = vld [vmem:[%s420_s5 + $0x30] sm:$0xff]  }
   0x2   :  { %298 = vmatprep.subr.bf16.mxu0 %v330_v0  ;;  %314 = vmatprep.mubr.msk.bf16.mxu0 %vm331_vm0, %v330_v0  ;;  %v30_v2 = vld [vmem:[%s418_s1] sm:$0xf]  ;;  %v324_v6 = vld [vmem:[%s420_s5 + $0x28] sm:$0xff]   ;;  %v326_v9 = vld [vmem:[%s420_s5 + $0x18] sm:$0xff]  }
   0x3   :  { %287 = vmatpush3.bf16.msra.mxu1 %v320_v1  ;;  %v321_v3 = vld [vmem:[%s419_s2] sm:$0xff]   ;;  %299 = vmatpush3.bf16.msra.mxu0 %v322_v4  ;;  %v327_v10 = vld [vmem:[%s420_s5 + $0x10] sm:$0xff]   ;;  %v328_v11 = vld [vmem:[%s420_s5 + $0x8] sm:$0xff]  }
   0x4   :  { %292 = vmatprep.subr.bf16.mxu1 %v330_v0  ;;  %300 = vmatprep.subr.bf16.mxu0 %v330_v0  ;;  %v27_v7 = vld [vmem:[%s421_s0] sm:$0xf] }
   0x5   :  { %v325_v8 = vld [vmem:[%s420_s5 + $0x20] sm:$0xff]  }
   0x6   :  { %289 = vmatmul.mubr.msk.bf16.vlgmr.msra.gmra.mxu1 %vm39_vm1, %v30_v2  ;;  %v329_v12 = vld [vmem:[%s420_s5] sm:$0xff]  }
   0x7   :  { %293 = vmatpush3.bf16.msra.mxu1 %v321_v3  ;;  %294 = vmatprep.mubr.msk.bf16.mxu1 %vm331_vm0, %v330_v0  ;;  %v263_v18 = vld [vmem:[%s422_s4] ss:$0 sm:$0xff] }
   0x8   :  { %301 = vmatpush3.bf16.msra.mxu0 %v323_v5  ;;  %v264_v26 = vld [vmem:[%s423_s6] ss:$0 sm:$0xff] }
   0x9   :  { %302 = vmatprep.subr.bf16.mxu0 %v330_v0 }
   0xc   :  { %303 = vmatpush3.bf16.msra.mxu0 %v324_v6 }
   0xd   :  { %304 = vmatprep.subr.bf16.mxu0 %v330_v0 }
   0xe   :  { %295 = vmatmul.mubr.msk.bf16.vlgmr.msra.gmra.mxu1 %vm39_vm1, %v27_v7 }
  0x10   :  { %305 = vmatpush3.bf16.msra.mxu0 %v325_v8 }
  0x11   :  { %306 = vmatprep.subr.bf16.mxu0 %v330_v0 }
  0x14   :  { %307 = vmatpush3.bf16.msra.mxu0 %v326_v9 }
  0x15   :  { %308 = vmatprep.subr.bf16.mxu0 %v330_v0 }
  0x18   :  { %309 = vmatpush3.bf16.msra.mxu0 %v327_v10 }
  0x19   :  { %310 = vmatprep.subr.bf16.mxu0 %v330_v0 }
  0x1c   :  { %311 = vmatpush3.bf16.msra.mxu0 %v328_v11 }
  0x1d   :  { %312 = vmatprep.subr.bf16.mxu0 %v330_v0 }
  0x20   :  { %313 = vmatpush3.bf16.msra.mxu0 %v329_v12 }
  0xc6   :  { %v77_v13 = vpop.f32.mrf.mxu1 }
  0xc8   :  { %v290_v14 = vpop.f32.mrf.mxu1 }
  0xca   :  { %v80_v15 = vpop.f32.mrf.mxu1 }
  0xcc   :  { %v291_v16 = vpop.f32.mrf.mxu1 }
  0xce   :  { %v126_v17 = vpop.f32.mrf.mxu1 }
  0xcf   :  { %v127_v19 = vadd.f32 %v126_v17, %v77_v13 }
  0xd0   :  { %v296_v20 = vpop.f32.mrf.mxu1 }
  0xd1   :  { %v139_v21 = vadd.f32 %v263_v18, %v127_v19 }
  0xd2   :  { %v129_v22 = vpop.f32.mrf.mxu1 }
  0xd3   :  { %v140_v23 = vmax.f32 %v139_v21, 0.0 }
  0xd4   :  { %v297_v24 = vpop.f32.mrf.mxu1 }
  0xd5   :  { %v141_v25 = vpack.c.bf16 %v140_v23, %v140_v23 }
  0xd7   :  { %315 = vmatmul.mubr.bf16.vlgmr.msra.gmra.mxu0 %v141_v25 }
 0x197   :  { %v247_v27 = vpop.f32.mrf.mxu0 }
 0x198   :  { %v248_v28 = vadd.f32 %v264_v26, %v247_v27 }
 0x199   :  { %v316_v29 = vpop.f32.mrf.mxu0 }
 0x19a   :  { %254 = vst.msk [vmem:[%s424_s7] sm:$0xff] %vm253_vm2, %v248_v28 }
 0x19b   :  { %v250_v30 = vpop.f32.mrf.mxu0 }
 0x19d   :  { %v317_v31 = vpop.f32.mrf.mxu0 }

</bundles_post_ra>
